<compile_context>
chip_gen: v6e
topology: v6e:2x2x1
jax: 0.10.0
libtpu: 0.0.40
codegen_flags: <defaults>
</compile_context>

<pallas_src>
import functools

import jax
import jax.numpy as jnp
from jax.experimental import pallas as pl
from jax.experimental.pallas import tpu as pltpu

EPS = 1e-6        # T5LayerNorm default variance_epsilon
LANE = 128
SUBLANE = 8


def _round_up(x, m):
    return ((x + m - 1) // m) * m


def adapter_kernel(x_ref, wd_ref, bd_ref, wu_ref, bu_ref, g_ref, o_ref,
                   *, true_dim, matmul_dtype):
    # x_ref: (tm, dim_p) f32 token tile; (padded, bf16) weights resident in VMEM.
    x = x_ref[...]

    # TODO(synk): Dropout(p=0.2) is the eval-mode identity (no PRNG mask applied).

    # Down projection + ReLU  (bf16 MXU inputs, f32 accumulation).
    h = jnp.dot(x.astype(matmul_dtype), wd_ref[...],
                preferred_element_type=jnp.float32) + bd_ref[...]
    h = jnp.maximum(h, 0.0)

    # Up projection + residual (f32 residual path).
    y = jnp.dot(h.astype(matmul_dtype), wu_ref[...],
                preferred_element_type=jnp.float32) + bu_ref[...] + x

    # T5LayerNorm (RMS norm, no mean subtraction, no bias).
    # Padded feature columns of y are exactly zero, so the lane reduction only
    # sees real columns; divide by the TRUE dim (not the padded one).
    var = jnp.sum(y * y, axis=-1, keepdims=True) * (1.0 / true_dim)
    o_ref[...] = (y * jax.lax.rsqrt(var + EPS)) * g_ref[...]


def adapter_layer(inputs, w_down, b_down, w_up, b_up, ln_weight,
                  *, tm=256, matmul_dtype=jnp.bfloat16):
    """inputs: (B, S, dim) f32. Returns (B, S, dim) f32."""
    B, S, dim = inputs.shape
    down_dim = w_down.shape[1]
    N = B * S

    # Lane-dense feature dims (multiples of 128).
    dim_p = _round_up(dim, LANE)
    dd_p = _round_up(down_dim, LANE)

    # Row tile: large 128-multiple by default, clamped (to a sublane multiple)
    # when the problem is small.  For real shapes keep N//tm >= 2 so both v7x
    # TensorCores get work from the "parallel" grid axis.
    n_rows = _round_up(N, SUBLANE)
    tm = _round_up(min(tm, n_rows), SUBLANE)
    grid_m = pl.cdiv(n_rows, tm)
    n_pad = grid_m * tm

    x2d = jnp.pad(inputs.reshape(N, dim).astype(jnp.float32),
                  ((0, n_pad - N), (0, dim_p - dim)))
    wd = jnp.pad(w_down, ((0, dim_p - dim), (0, dd_p - down_dim))).astype(matmul_dtype)
    wu = jnp.pad(w_up, ((0, dd_p - down_dim), (0, dim_p - dim))).astype(matmul_dtype)
    bd = jnp.pad(b_down, (0, dd_p - down_dim)).reshape(1, dd_p).astype(jnp.float32)
    bu = jnp.pad(b_up, (0, dim_p - dim)).reshape(1, dim_p).astype(jnp.float32)
    g = jnp.pad(ln_weight, (0, dim_p - dim)).reshape(1, dim_p).astype(jnp.float32)

    # VMEM budget: double-buffered x/out tiles + resident weights + h scratch,
    # plus headroom; capped at 64 MiB so it also fits v7x physical VMEM.
    w_item = jnp.dtype(matmul_dtype).itemsize
    tile_bytes = 2 * tm * dim_p * 4 * 2                       # x + out, 2 buffers each
    w_bytes = 2 * (dim_p * dd_p + dd_p * dim_p) * w_item      # weights, 2 buffers
    h_bytes = tm * dd_p * 4
    vmem_limit = int(min(64 << 20, tile_bytes + w_bytes + h_bytes + (16 << 20)))

    out = pl.pallas_call(
        functools.partial(adapter_kernel, true_dim=dim, matmul_dtype=matmul_dtype),
        out_shape=jax.ShapeDtypeStruct((n_pad, dim_p), jnp.float32),
        grid_spec=pltpu.PrefetchScalarGridSpec(
            num_scalar_prefetch=0,
            grid=(grid_m,),
            in_specs=[
                pl.BlockSpec((tm, dim_p), lambda i: (i, 0)),     # x tile
                pl.BlockSpec((dim_p, dd_p), lambda i: (0, 0)),   # W_down (constant block)
                pl.BlockSpec((1, dd_p), lambda i: (0, 0)),       # b_down
                pl.BlockSpec((dd_p, dim_p), lambda i: (0, 0)),   # W_up   (constant block)
                pl.BlockSpec((1, dim_p), lambda i: (0, 0)),      # b_up
                pl.BlockSpec((1, dim_p), lambda i: (0, 0)),      # layer_norm weight
            ],
            out_specs=pl.BlockSpec((tm, dim_p), lambda i: (i, 0)),
        ),
        compiler_params=pltpu.CompilerParams(
            dimension_semantics=("parallel",),
            vmem_limit_bytes=vmem_limit,
        ),
    )(x2d, wd, bd, wu, bu, g)

    return out[:N, :dim].reshape(B, S, dim)


def reference(inputs, w_down, b_down, w_up, b_up, ln_weight):
    x = inputs  # eval-mode dropout
    h = jnp.maximum(x @ w_down + b_down, 0.0)
    y = h @ w_up + b_up + x
    var = jnp.mean(y * y, axis=-1, keepdims=True)
    return y * jax.lax.rsqrt(var + EPS) * ln_weight


if __name__ == "__main__":
    # Small shapes consistent with the module: seq of hidden vectors.
    B, S, dim, down_dim = 2, 8, 32, 16

    key = jax.random.PRNGKey(0)
    k_in, k_wd, k_bd, k_wu, k_bu, k_g = jax.random.split(key, 6)

    inputs = jax.random.normal(k_in, (B, S, dim), dtype=jnp.float32)
    # Module __init__ shapes:
    #   down: Linear(dim, down_dim)  -> W_down (dim, down_dim), b_down (down_dim,)
    #   up:   Linear(down_dim, dim)  -> W_up (down_dim, dim),   b_up   (dim,)
    #   layer_norm: T5LayerNorm(dim) -> weight (dim,)
    w_down = jax.random.normal(k_wd, (dim, down_dim), dtype=jnp.float32) * 0.1
    b_down = jax.random.normal(k_bd, (down_dim,), dtype=jnp.float32) * 0.1
    w_up = jax.random.normal(k_wu, (down_dim, dim), dtype=jnp.float32) * 0.1
    b_up = jax.random.normal(k_bu, (dim,), dtype=jnp.float32) * 0.1
    ln_weight = 1.0 + 0.05 * jax.random.normal(k_g, (dim,), dtype=jnp.float32)

    out = adapter_layer(inputs, w_down, b_down, w_up, b_up, ln_weight)
    out = jax.block_until_ready(out)

    ref = reference(inputs, w_down, b_down, w_up, b_up, ln_weight)
    assert out.shape == (B, S, dim)
    assert bool(jnp.all(jnp.isfinite(out))), "non-finite output"
    # bf16 matmul operands (f32 accumulation) vs the pure-f32 reference.
    assert jnp.allclose(out, ref, atol=5e-2, rtol=5e-2), "mismatch vs reference"

    print("KERNEL_OK")
</pallas_src>

<mosaic_0001>
module attributes {stable_mosaic.version = 11 : i64} {
  func.func @adapter_kernel(%arg0: i32, %arg1: memref<16x128xf32, #tpu.memory_space<vmem>>, %arg2: memref<128x128xbf16, #tpu.memory_space<vmem>>, %arg3: memref<1x128xf32, #tpu.memory_space<vmem>>, %arg4: memref<128x128xbf16, #tpu.memory_space<vmem>>, %arg5: memref<1x128xf32, #tpu.memory_space<vmem>>, %arg6: memref<1x128xf32, #tpu.memory_space<vmem>>, %arg7: memref<16x128xf32, #tpu.memory_space<vmem>>) attributes {dimension_semantics = [#tpu.dimension_semantics<parallel>], iteration_bounds = array<i64: 1>, scalar_prefetch = 0 : i64, scratch_operands = 0 : i64, tpu.core_type = #tpu.core_type<tc>, window_params = [{transform_indices = @transform_0, window_bounds = array<i64: 16, 128>}, {pipeline_mode = #tpu.pipeline_mode<synchronous>, transform_indices = @transform_1, window_bounds = array<i64: 128, 128>}, {pipeline_mode = #tpu.pipeline_mode<synchronous>, transform_indices = @transform_2, window_bounds = array<i64: 1, 128>}, {pipeline_mode = #tpu.pipeline_mode<synchronous>, transform_indices = @transform_3, window_bounds = array<i64: 128, 128>}, {pipeline_mode = #tpu.pipeline_mode<synchronous>, transform_indices = @transform_4, window_bounds = array<i64: 1, 128>}, {pipeline_mode = #tpu.pipeline_mode<synchronous>, transform_indices = @transform_5, window_bounds = array<i64: 1, 128>}, {transform_indices = @transform_6, window_bounds = array<i64: 16, 128>}]} {
    %c0 = arith.constant 0 : index
    %c0_0 = arith.constant 0 : index
    %0 = vector.load %arg1[%c0, %c0_0] : memref<16x128xf32, #tpu.memory_space<vmem>>, vector<16x128xf32>
    %1 = arith.truncf %0 : vector<16x128xf32> to vector<16x128xbf16>
    %c0_1 = arith.constant 0 : index
    %c0_2 = arith.constant 0 : index
    %2 = vector.load %arg2[%c0_1, %c0_2] : memref<128x128xbf16, #tpu.memory_space<vmem>>, vector<128x128xbf16>
    %cst = arith.constant dense<0.000000e+00> : vector<16x128xf32>
    %3 = tpu.matmul %1, %2, %cst {dimension_numbers = #tpu.dot_dimension_numbers<[1], [0], [0], [1], [0, 0, 1, 1], [], []>} : vector<16x128xbf16>, vector<128x128xbf16>, vector<16x128xf32> -> vector<16x128xf32>
    %c0_3 = arith.constant 0 : index
    %c0_4 = arith.constant 0 : index
    %4 = vector.load %arg3[%c0_3, %c0_4] : memref<1x128xf32, #tpu.memory_space<vmem>>, vector<1x128xf32>
    %5 = vector.broadcast %4 : vector<1x128xf32> to vector<16x128xf32>
    %6 = arith.addf %3, %5 : vector<16x128xf32>
    %cst_5 = arith.constant 0.000000e+00 : f32
    %7 = vector.broadcast %cst_5 : f32 to vector<16x128xf32>
    %8 = arith.maximumf %6, %7 : vector<16x128xf32>
    %9 = arith.truncf %8 : vector<16x128xf32> to vector<16x128xbf16>
    %c0_6 = arith.constant 0 : index
    %c0_7 = arith.constant 0 : index
    %10 = vector.load %arg4[%c0_6, %c0_7] : memref<128x128xbf16, #tpu.memory_space<vmem>>, vector<128x128xbf16>
    %cst_8 = arith.constant dense<0.000000e+00> : vector<16x128xf32>
    %11 = tpu.matmul %9, %10, %cst_8 {dimension_numbers = #tpu.dot_dimension_numbers<[1], [0], [0], [1], [0, 0, 1, 1], [], []>} : vector<16x128xbf16>, vector<128x128xbf16>, vector<16x128xf32> -> vector<16x128xf32>
    %c0_9 = arith.constant 0 : index
    %c0_10 = arith.constant 0 : index
    %12 = vector.load %arg5[%c0_9, %c0_10] : memref<1x128xf32, #tpu.memory_space<vmem>>, vector<1x128xf32>
    %13 = vector.broadcast %12 : vector<1x128xf32> to vector<16x128xf32>
    %14 = arith.addf %11, %13 : vector<16x128xf32>
    %15 = arith.addf %14, %0 : vector<16x128xf32>
    %16 = arith.mulf %15, %15 : vector<16x128xf32>
    %cst_11 = arith.constant dense<0.000000e+00> : vector<16xf32>
    %17 = vector.multi_reduction <add>, %16, %cst_11 [1] : vector<16x128xf32> to vector<16xf32>
    %18 = vector.shape_cast %17 : vector<16xf32> to vector<16x1xf32>
    %cst_12 = arith.constant 3.125000e-02 : f32
    %19 = vector.broadcast %cst_12 : f32 to vector<16x1xf32>
    %20 = arith.mulf %18, %19 : vector<16x1xf32>
    %cst_13 = arith.constant 9.99999997E-7 : f32
    %21 = vector.broadcast %cst_13 : f32 to vector<16x1xf32>
    %22 = arith.addf %20, %21 : vector<16x1xf32>
    %23 = math.rsqrt %22 : vector<16x1xf32>
    %24 = vector.broadcast %23 : vector<16x1xf32> to vector<16x128xf32>
    %25 = arith.mulf %15, %24 : vector<16x128xf32>
    %c0_14 = arith.constant 0 : index
    %c0_15 = arith.constant 0 : index
    %26 = vector.load %arg6[%c0_14, %c0_15] : memref<1x128xf32, #tpu.memory_space<vmem>>, vector<1x128xf32>
    %27 = vector.broadcast %26 : vector<1x128xf32> to vector<16x128xf32>
    %28 = arith.mulf %25, %27 : vector<16x128xf32>
    %c0_16 = arith.constant 0 : index
    %c0_17 = arith.constant 0 : index
    %29 = vector.load %arg7[%c0_16, %c0_17] : memref<16x128xf32, #tpu.memory_space<vmem>>, vector<16x128xf32>
    tpu.vector_store %arg7[%c0_16, %c0_17], %28 {strides = array<i32>} : memref<16x128xf32, #tpu.memory_space<vmem>>, vector<16x128xf32>,
    return
  }
  func.func @transform_0(%arg0: i32) -> (i32, i32) {
    %c0_i32 = arith.constant 0 : i32
    %c0_i32_0 = arith.constant 0 : i32
    return %arg0, %c0_i32 : i32, i32
  }
  func.func @transform_1(%arg0: i32) -> (i32, i32) {
    %c0_i32 = arith.constant 0 : i32
    %c0_i32_0 = arith.constant 0 : i32
    %c0_i32_1 = arith.constant 0 : i32
    return %c0_i32, %c0_i32_0 : i32, i32
  }
  func.func @transform_2(%arg0: i32) -> (i32, i32) {
    %c0_i32 = arith.constant 0 : i32
    %c0_i32_0 = arith.constant 0 : i32
    %c0_i32_1 = arith.constant 0 : i32
    return %c0_i32, %c0_i32_0 : i32, i32
  }
  func.func @transform_3(%arg0: i32) -> (i32, i32) {
    %c0_i32 = arith.constant 0 : i32
    %c0_i32_0 = arith.constant 0 : i32
    %c0_i32_1 = arith.constant 0 : i32
    return %c0_i32, %c0_i32_0 : i32, i32
  }
  func.func @transform_4(%arg0: i32) -> (i32, i32) {
    %c0_i32 = arith.constant 0 : i32
    %c0_i32_0 = arith.constant 0 : i32
    %c0_i32_1 = arith.constant 0 : i32
    return %c0_i32, %c0_i32_0 : i32, i32
  }
  func.func @transform_5(%arg0: i32) -> (i32, i32) {
    %c0_i32 = arith.constant 0 : i32
    %c0_i32_0 = arith.constant 0 : i32
    %c0_i32_1 = arith.constant 0 : i32
    return %c0_i32, %c0_i32_0 : i32, i32
  }
  func.func @transform_6(%arg0: i32) -> (i32, i32) {
    %c0_i32 = arith.constant 0 : i32
    %c0_i32_0 = arith.constant 0 : i32
    return %arg0, %c0_i32 : i32, i32
  }
}

</mosaic_0001>

<bundles_post_ra>
// kernel: tpu_custom_call.1
= control target key start
LH: loop header
LB: loop body
LE: loop exit
PB: predicated region body
PF: predicated region fallthrough
CT: control target
= control target key end

     0   :  { %11 = vsyncpa [#allocation3], 0  ;;  %s606_s0 = inlined_call_operand.hbm [shape: f32[16,128], index: 0, kind: input, shape index: {}]   ;;  %s607_s1 = inlined_call_operand.hbm [shape: bf16[128,128], index: 1, kind: input, shape index: {}]   ;;  %s608_s2 = inlined_call_operand.vmem [shape: f32[1,128], index: 2, kind: input, shape index: {}]   ;;  %s609_s3 = inlined_call_operand.hbm [shape: bf16[128,128], index: 3, kind: input, shape index: {}]   ;;  %s610_s4 = inlined_call_operand.vmem [shape: f32[1,128], index: 4, kind: input, shape index: {}]   ;;  %s611_s5 = inlined_call_operand.vmem [shape: f32[1,128], index: 5, kind: input, shape index: {}]   ;;  %s612_s6 = inlined_call_operand.hbm [shape: f32[16,128], index: 6, kind: output, shape index: {}]  }
   0x1   :  { %12 = vsyncpa [#allocation6], 0 }
   0x2   :  { %13 = vsyncpa [#allocation4], 0  ;;  %s534_s21 = smov [#allocation5]  }
   0x3   :  { %s31_s22 = sshll.u32 %s534_s21, 4  ;;  %s32_s22 = int_to_ptr.vmem [resolvable:$true] %s31_s22 }
   0x4   :  { %s456_s23 = scalar_lea.vmem %s32_s22, 1024  ;;  %p461_p1 = scmp.lt.s32.totalorder %s32_s22, %s32_s22 }
   0x5   :  { %p457_p0 = scmp.ne.s32.totalorder %s32_s22, %s456_s23  ;;  %p462_p2 = scmp.lt.s32.totalorder %s456_s23, %s456_s23 }
   0x7   :  { %p463_p3 = por %p462_p2, %p461_p1 }
   0x9   :  { %p464_p4 = pnand %p463_p3, %p457_p0 }
   0xb   :  { %467 = shalt.err (!%p464_p4)
}
   0xc   :  { %s535_s24 = smov 64   ;;  %s536_s25 = smov 4  }
   0xd   :  { %37 = dma.hbm_to_vmem [thread:$0]  %s607_s1, 1024, %s32_s22, [#allocation6], %s535_s24, %s535_s24, %s536_s25  }
   0xe   :  { %s537_s28 = smov [#allocation2]  }
   0xf   :  { %s19_s29 = sshll.u32 %s537_s28, 4  ;;  %s20_s29 = int_to_ptr.vmem [resolvable:$true] %s19_s29 }
  0x10   :  { %s476_s30 = scalar_lea.vmem %s20_s29, 256  ;;  %p481_p6 = scmp.lt.s32.totalorder %s20_s29, %s20_s29 }
  0x11   :  { %p477_p5 = scmp.ne.s32.totalorder %s20_s29, %s476_s30  ;;  %p482_p7 = scmp.lt.s32.totalorder %s476_s30, %s476_s30 }
  0x13   :  { %p483_p8 = por %p482_p7, %p481_p6 }
  0x15   :  { %p484_p9 = pnand %p483_p8, %p477_p5 }
  0x17   :  { %487 = shalt.err (!%p484_p9)
}
  0x18   :  { %s538_s7 = smov 128   ;;  %s539_s8 = smov 8  }
  0x19   :  { %25 = dma.hbm_to_vmem [thread:$0]  %s606_s0, 256, %s20_s29, [#allocation3], %s538_s7, %s538_s7, %s539_s8  }
  0x1a   :  { %s540_s1 = smov [#allocation7]  }
  0x1b   :  { %s45_s11 = sshll.u32 %s540_s1, 4  ;;  %s46_s11 = int_to_ptr.vmem [resolvable:$true] %s45_s11 }
  0x1c   :  { %s496_s12 = scalar_lea.vmem %s46_s11, 1024  ;;  %p501_p11 = scmp.lt.s32.totalorder %s46_s11, %s46_s11 }
  0x1d   :  { %p497_p10 = scmp.ne.s32.totalorder %s46_s11, %s496_s12  ;;  %p502_p12 = scmp.lt.s32.totalorder %s496_s12, %s496_s12 }
  0x1f   :  { %p503_p13 = por %p502_p12, %p501_p11 }
  0x21   :  { %p504_p0 = pnand %p503_p13, %p497_p10 }
  0x23   :  { %507 = shalt.err (!%p504_p0)
}
  0x24   :  { %51 = dma.hbm_to_vmem [thread:$0]  %s609_s3, 1024, %s46_s11, [#allocation6], %s535_s24, %s535_s24, %s536_s25  }
  0x25   :  { %528 = dma.done.wait [#allocation3], 256  }
  0x26   :  { %529 = vsyncadd [#allocation3], 4294967040 }
  0x27   :  { %530 = dma.done.wait [#allocation6], 2048  }
  0x28   :  { %531 = vsyncadd [#allocation6], 4294965248  ;;  %v541_v0 = vmov 0.0   ;;  %vm542_vm0 = vmmov 0   ;;  %v428_v1 = vld [vmem:[#allocation5 + $0x38] sm:$0xff]   ;;  %v429_v2 = vld [vmem:[#allocation5 + $0x30] sm:$0xff]  }
  0x29   :  { %378 = vmatprep.subr.bf16.mxu0 %v541_v0  ;;  %394 = vmatprep.mubr.msk.bf16.mxu0 %vm542_vm0, %v541_v0  ;;  %v430_v3 = vld [vmem:[#allocation5 + $0x28] sm:$0xff]   ;;  %v436_v4 = vld [vmem:[#allocation7 + $0x38] sm:$0xff]   ;;  %v431_v5 = vld [vmem:[#allocation5 + $0x20] sm:$0xff]   ;;  %s543_s17 = smov [#allocation8]  }
  0x2a   :  { %398 = vmatprep.subr.bf16.mxu1 %v541_v0  ;;  %414 = vmatprep.mubr.msk.bf16.mxu1 %vm542_vm0, %v541_v0  ;;  %v437_v6 = vld [vmem:[#allocation7 + $0x30] sm:$0xff]   ;;  %v432_v7 = vld [vmem:[#allocation5 + $0x18] sm:$0xff]   ;;  %v438_v8 = vld [vmem:[#allocation7 + $0x28] sm:$0xff]   ;;  %s328_s18 = sshll.u32 %s543_s17, 4  ;;  %s329_s18 = int_to_ptr.vmem [resolvable:$true] %s328_s18 }
  0x2b   :  { %379 = vmatpush3.bf16.msra.mxu0 %v428_v1  ;;  %399 = vmatpush3.bf16.msra.mxu1 %v436_v4  ;;  %v433_v9 = vld [vmem:[#allocation5 + $0x10] sm:$0xff]   ;;  %v439_v10 = vld [vmem:[#allocation7 + $0x20] sm:$0xff]   ;;  %v434_v11 = vld [vmem:[#allocation5 + $0x8] sm:$0xff]   ;;  %s508_s19 = scalar_lea.vmem %s329_s18, 256  ;;  %p513_p2 = scmp.lt.s32.totalorder %s329_s18, %s329_s18 }
  0x2c   :  { %380 = vmatprep.subr.bf16.mxu0 %v541_v0  ;;  %400 = vmatprep.subr.bf16.mxu1 %v541_v0  ;;  %v440_v12 = vld [vmem:[#allocation7 + $0x18] sm:$0xff]   ;;  %v435_v13 = vld [vmem:[#allocation5] sm:$0xff]   ;;  %v66_v14 = vld [vmem:[#allocation2] sm:$0xff]  ;;  %p509_p1 = scmp.ne.s32.totalorder %s329_s18, %s508_s19  ;;  %p514_p3 = scmp.lt.s32.totalorder %s508_s19, %s508_s19 }
  0x2d   :  { %v67_v15 = vld [vmem:[#allocation2 + $0x8] sm:$0xff]  ;;  %v441_v17 = vld [vmem:[#allocation7 + $0x10] sm:$0xff]   ;;  %v442_v18 = vld [vmem:[#allocation7 + $0x8] sm:$0xff]  }
  0x2e   :  { %v68_v16 = vpack.c.bf16 %v67_v15, %v66_v14  ;;  %v443_v19 = vld [vmem:[#allocation7] sm:$0xff]   ;;  %v341_v20 = vld [vmem:[%s608_s2] ss:$0 sm:$0xff]  ;;  %p515_p4 = por %p514_p3, %p513_p2 }
  0x2f   :  { %381 = vmatpush3.bf16.msra.mxu0 %v429_v2  ;;  %401 = vmatpush3.bf16.msra.mxu1 %v437_v6  ;;  %v350_v30 = vld [vmem:[%s610_s4] ss:$0 sm:$0xff] }
  0x30   :  { %382 = vmatprep.subr.bf16.mxu0 %v541_v0  ;;  %402 = vmatprep.subr.bf16.mxu1 %v541_v0  ;;  %v359_v48 = vld [vmem:[%s611_s5] ss:$0 sm:$0xff]  ;;  %p516_p5 = pnand %p515_p4, %p509_p1 }
  0x33   :  { %383 = vmatpush3.bf16.msra.mxu0 %v430_v3  ;;  %403 = vmatpush3.bf16.msra.mxu1 %v438_v8 }
  0x34   :  { %384 = vmatprep.subr.bf16.mxu0 %v541_v0  ;;  %404 = vmatprep.subr.bf16.mxu1 %v541_v0 }
  0x37   :  { %385 = vmatpush3.bf16.msra.mxu0 %v431_v5  ;;  %405 = vmatpush3.bf16.msra.mxu1 %v439_v10 }
  0x38   :  { %386 = vmatprep.subr.bf16.mxu0 %v541_v0  ;;  %406 = vmatprep.subr.bf16.mxu1 %v541_v0 }
  0x3b   :  { %387 = vmatpush3.bf16.msra.mxu0 %v432_v7  ;;  %407 = vmatpush3.bf16.msra.mxu1 %v440_v12 }
  0x3c   :  { %388 = vmatprep.subr.bf16.mxu0 %v541_v0  ;;  %408 = vmatprep.subr.bf16.mxu1 %v541_v0 }
  0x3f   :  { %389 = vmatpush3.bf16.msra.mxu0 %v433_v9  ;;  %409 = vmatpush3.bf16.msra.mxu1 %v441_v17 }
  0x40   :  { %390 = vmatprep.subr.bf16.mxu0 %v541_v0  ;;  %410 = vmatprep.subr.bf16.mxu1 %v541_v0 }
  0x43   :  { %391 = vmatpush3.bf16.msra.mxu0 %v434_v11  ;;  %411 = vmatpush3.bf16.msra.mxu1 %v442_v18 }
  0x44   :  { %392 = vmatprep.subr.bf16.mxu0 %v541_v0  ;;  %412 = vmatprep.subr.bf16.mxu1 %v541_v0 }
  0x47   :  { %393 = vmatpush3.bf16.msra.mxu0 %v435_v13  ;;  %413 = vmatpush3.bf16.msra.mxu1 %v443_v19 }
  0x4a   :  { %395 = vmatmul.mubr.bf16.vlgmr.msra.gmra.mxu0 %v68_v16 }
 0x10a   :  { %v174_v21 = vpop.f32.mrf.mxu0 }
 0x10b   :  { %v175_v23 = vadd.f32 %v341_v20, %v174_v21 }
 0x10c   :  { %v396_v22 = vpop.f32.mrf.mxu0 }
 0x10d   :  { %v181_v27 = vmax.f32 %v175_v23, 0.0 }
 0x10e   :  { %v177_v24 = vpop.f32.mrf.mxu0 }
 0x10f   :  { %v178_v25 = vadd.f32 %v341_v20, %v177_v24 }
 0x110   :  { %v397_v26 = vpop.f32.mrf.mxu0 }
 0x111   :  { %v182_v28 = vmax.f32 %v178_v25, 0.0 }
 0x113   :  { %v183_v29 = vpack.c.bf16 %v182_v28, %v181_v27 }
 0x115   :  { %415 = vmatmul.mubr.bf16.vlgmr.msra.gmra.mxu1 %v183_v29 }
 0x1d5   :  { %v289_v31 = vpop.f32.mrf.mxu1 }
 0x1d6   :  { %v290_v32 = vadd.f32 %v350_v30, %v289_v31 }
 0x1d7   :  { %v416_v33 = vpop.f32.mrf.mxu1 }
 0x1d8   :  { %v296_v34 = vadd.f32 %v290_v32, %v66_v14 }
 0x1d9   :  { %v292_v35 = vpop.f32.mrf.mxu1 }
 0x1da   :  { %v293_v36 = vadd.f32 %v350_v30, %v292_v35  ;;  %v298_v37 = vmul.f32 %v296_v34, %v296_v34 }
 0x1db   :  { %v417_v38 = vpop.f32.mrf.mxu1 }
 0x1dc   :  { %v297_v39 = vadd.f32 %v293_v36, %v67_v15  ;;  %300 = vadd.xlane.f32.xlu0 %v298_v37 }
 0x1de   :  { %v299_v40 = vmul.f32 %v297_v39, %v297_v39 }
 0x1e0   :  { %302 = vadd.xlane.f32.xlu0 %v299_v40 }
 0x265   :  { %v301_v41 = vpop.xlane.xlu0 %300 }
 0x266   :  { %v304_v42 = vmul.f32 0.03125, %v301_v41 }
 0x268   :  { %v306_v43 = vadd.f32 1e-06, %v304_v42 }
 0x269   :  { %v303_v44 = vpop.xlane.xlu0 %302 }
 0x26a   :  { %444 = vrsqrt.f32 %v306_v43  ;;  %v305_v45 = vmul.f32 0.03125, %v303_v44 }
 0x26c   :  { %v307_v46 = vadd.f32 1e-06, %v305_v45 }
 0x26e   :  { %446 = vrsqrt.f32 %v307_v46 }
 0x277   :  { %v445_v47 = vpop.eup %444 }
 0x278   :  { %v310_v49 = vmul.f32 %v445_v47, %v296_v34 }
 0x27a   :  { %v319_v50 = vmul.f32 %v359_v48, %v310_v49 }
 0x27b   :  { %v447_v51 = vpop.eup %446 }
 0x27c   :  { %v311_v52 = vmul.f32 %v447_v51, %v297_v39  ;;  %321 = vst [vmem:[#allocation8] sm:$0xff] %v319_v50 }
 0x27e   :  { %v320_v53 = vmul.f32 %v359_v48, %v311_v52 }
 0x280   :  { %322 = vst [vmem:[#allocation8 + $0x8] sm:$0xff] %v320_v53 }
 0x281   :  { %519 = shalt.err (!%p516_p5)
}
 0x282   :  { %334 = dma.vmem_to_hbm [thread:$0]  %s329_s18, 256, %s612_s6, [#allocation4], %s538_s7, %s538_s7, %s539_s8  }
 0x283   :  { %532 = dma.done.wait [#allocation4], 256  }
 0x284   :  { %533 = vsyncadd [#allocation4], 4294967040 }
 0x285   :  { %338 = vsyncpa [#allocation3], 1 }
 0x286   :  { %339 = vsyncpa [#allocation6], 1 }
 0x287   :  { %340 = vsyncpa [#allocation4], 1 }

</bundles_post_ra>
